<compile_context>
chip_gen: v5e
topology: v5e:2x2
jax: 0.10.0
libtpu: 0.0.40
codegen_flags: <defaults>
</compile_context>

<pallas_src>
import functools

import jax
import jax.numpy as jnp
from jax.experimental import pallas as pl
from jax.experimental.pallas import tpu as pltpu

LANE = 128
MAX_TILE_R = 2048          # (2048, 128) f32 = 1 MiB per input buffer
ROW_ALIGN = 32             # sublane packing safe for f32 / bf16 / int8
PAD_LOGIT = -1.0e4         # sigmoid(-1e4) == 0 exactly; BCE term == 0 exactly


def _round_up(a, b):
    return -(-a // b) * b


def _num_tensorcores():
    """2 on v7x-style multi-TC chips, else 1 (conservative detection)."""
    try:
        kind = (getattr(jax.devices()[0], "device_kind", "") or "").lower()
    except Exception:
        return 1
    return 2 if ("v7" in kind or "tpu7" in kind or "7x" in kind) else 1


def _dice_bce_kernel(x_ref, t_ref, o_ref, *, tile_r, rows, steps_per_core):
    c = pl.program_id(0)
    i = pl.program_id(1)

    @pl.when(i == 0)
    def _init():
        o_ref[...] = jnp.zeros_like(o_ref)

    # Mask rows beyond the (static) row count: handles the ragged last tile
    # and any clamped duplicate block from the core split.
    step = c * steps_per_core + i
    row0 = step * tile_r
    row_ids = row0 + jax.lax.broadcasted_iota(jnp.int32, (tile_r, LANE), 0)
    valid = row_ids < rows

    x = jnp.where(valid, x_ref[...].astype(jnp.float32), PAD_LOGIT)  # logits
    t = jnp.where(valid, t_ref[...].astype(jnp.float32), 0.0)        # targets

    # Shared-exp stable sigmoid / log-sigmoid: 3 EUP ops total.
    z = jnp.exp(-jnp.abs(x))                       # exp
    l1pz = jnp.log1p(z)                            # log
    nonneg = x >= 0.0
    p = jnp.where(nonneg, 1.0, z) / (1.0 + z)      # reciprocal; == sigmoid(x)
    ls = jnp.where(nonneg, -l1pz, x - l1pz)        # == log(sigmoid(x))
    # -(t*log(p) + (1-t)*log(1-p)) with log(1-p) = ls - x
    bce = (1.0 - t) * x - ls

    def red(v):
        # (tile_r, 128) -> (8, 128) using only vreg-wise VPU adds.
        return jnp.sum(v.reshape(tile_r // 8, 8, LANE), axis=0)

    # Single aligned (4, 8, 128) accumulator RMW per grid step.
    o_ref[...] = o_ref[...] + jnp.stack(
        [red(p * t),   # intersection
         red(p),       # sum(sigmoid(x))
         red(t),       # sum(targets)
         red(bce)])    # sum of elementwise BCE


def dice_bce_loss(inputs, targets, smooth=1.0):
    """Pallas implementation of DiceBCELoss.forward(inputs, targets, smooth).

    Inputs may be f32/bf16 logits and f32/bf16/uint8 targets; the kernel
    casts to f32 in VMEM, so narrower HBM streams pass straight through.
    """
    x = inputs.reshape(-1)
    t = targets.reshape(-1)
    n = x.shape[0]

    # Pad only the sub-128 tail (rare for NCHW shapes).  Padded elements
    # contribute exactly 0 to all four partial sums.
    tail = (-n) % LANE
    if tail:
        x = jnp.pad(x, (0, tail), constant_values=PAD_LOGIT)
        t = jnp.pad(t, (0, tail), constant_values=0)
    rows = (n + tail) // LANE

    tile_r = min(MAX_TILE_R, _round_up(rows, ROW_ALIGN))
    steps_total = -(-rows // tile_r)
    num_cores = _num_tensorcores()
    if steps_total < 2:
        num_cores = 1
    steps_per_core = -(-steps_total // num_cores)

    x2 = x.reshape(rows, LANE)
    t2 = t.reshape(rows, LANE)

    kernel = functools.partial(
        _dice_bce_kernel, tile_r=tile_r, rows=rows, steps_per_core=steps_per_core)

    last_block = steps_total - 1

    def in_idx(c, i):
        # Clamp a (possibly) fully out-of-range duplicate block to the last
        # valid block; the kernel masks its contribution to zero.
        return (jnp.minimum(c * steps_per_core + i, last_block), 0)

    partials = pl.pallas_call(
        kernel,
        out_shape=jax.ShapeDtypeStruct((num_cores * 4, 8, LANE), jnp.float32),
        grid_spec=pltpu.PrefetchScalarGridSpec(
            num_scalar_prefetch=0,
            grid=(num_cores, steps_per_core),
            in_specs=[
                pl.BlockSpec((tile_r, LANE), in_idx),
                pl.BlockSpec((tile_r, LANE), in_idx),
            ],
            out_specs=pl.BlockSpec((4, 8, LANE), lambda c, i: (c, 0, 0)),
        ),
        compiler_params=pltpu.CompilerParams(
            dimension_semantics=("parallel", "arbitrary"),
        ),
    )(x2, t2)

    # Combine per-core vector partials and do the tiny scalar epilogue in JAX.
    sums = partials.reshape(num_cores, 4, -1).sum(axis=(0, 2))
    inter, p_sum, t_sum, bce_sum = sums[0], sums[1], sums[2], sums[3]
    dice_loss = 1.0 - (2.0 * inter + smooth) / (p_sum + t_sum + smooth)
    bce = bce_sum / jnp.float32(n)
    return bce + dice_loss


def _reference_dice_bce(inputs, targets, smooth=1.0):
    """Pure-JAX reference matching the PyTorch module.

    Note: torch's F.binary_cross_entropy clamps log terms at -100, so for
    |logit| > ~100 the mathematically exact value used here differs slightly.
    """
    x = inputs.astype(jnp.float32).reshape(-1)
    t = targets.astype(jnp.float32).reshape(-1)
    p = jax.nn.sigmoid(x)
    inter = jnp.sum(p * t)
    dice = 1.0 - (2.0 * inter + smooth) / (jnp.sum(p) + jnp.sum(t) + smooth)
    bce = jnp.mean((1.0 - t) * x - jax.nn.log_sigmoid(x))
    return bce + dice


if __name__ == "__main__":
    key = jax.random.PRNGKey(0)
    k1, k2 = jax.random.split(key)

    B, C, H, W = 2, 4, 16, 16  # NCHW, as in the PyTorch module's usage
    logits = jax.random.normal(k1, (B, C, H, W), dtype=jnp.float32)
    targets = (jax.random.uniform(k2, (B, C, H, W)) > 0.5).astype(jnp.float32)

    loss = dice_bce_loss(logits, targets, smooth=1.0)
    loss = jax.block_until_ready(loss)

    ref = _reference_dice_bce(logits, targets, smooth=1.0)
    assert jnp.allclose(loss, ref, rtol=1e-4, atol=1e-4), (loss, ref)

    print("KERNEL_OK")
</pallas_src>

<mosaic_0001>
module attributes {stable_mosaic.version = 11 : i64} {
  func.func @_dice_bce_kernel(%arg0: i32, %arg1: i32, %arg2: memref<32x128xf32, #tpu.memory_space<vmem>>, %arg3: memref<32x128xf32, #tpu.memory_space<vmem>>, %arg4: memref<4x8x128xf32, #tpu.memory_space<vmem>>) attributes {dimension_semantics = [#tpu.dimension_semantics<parallel>, #tpu.dimension_semantics<arbitrary>], iteration_bounds = array<i64: 1, 1>, scalar_prefetch = 0 : i64, scratch_operands = 0 : i64, tpu.core_type = #tpu.core_type<tc>, window_params = [{transform_indices = @transform_0, window_bounds = array<i64: 32, 128>}, {transform_indices = @transform_1, window_bounds = array<i64: 32, 128>}, {transform_indices = @transform_2, window_bounds = array<i64: 4, 8, 128>}]} {
    %c0_i32 = arith.constant 0 : i32
    %0 = arith.cmpi eq, %arg1, %c0_i32 : i32
    %1 = arith.extui %0 : i1 to i32
    %c0_i32_0 = arith.constant 0 : i32
    %2 = arith.cmpi ne, %1, %c0_i32_0 : i32
    scf.if %2 {
      %cst_21 = arith.constant 0.000000e+00 : f32
      %54 = vector.broadcast %cst_21 : f32 to vector<4x8x128xf32>
      %c0_22 = arith.constant 0 : index
      %c0_23 = arith.constant 0 : index
      %c0_24 = arith.constant 0 : index
      %55 = vector.load %arg4[%c0_22, %c0_23, %c0_24] : memref<4x8x128xf32, #tpu.memory_space<vmem>>, vector<4x8x128xf32>
      tpu.vector_store %arg4[%c0_22, %c0_23, %c0_24], %54 {strides = array<i32>} : memref<4x8x128xf32, #tpu.memory_space<vmem>>, vector<4x8x128xf32>,
    } else {
    }
    %c1_i32 = arith.constant 1 : i32
    %3 = arith.muli %arg0, %c1_i32 : i32
    %4 = arith.addi %3, %arg1 : i32
    %c32_i32 = arith.constant 32 : i32
    %5 = arith.muli %4, %c32_i32 : i32
    %6 = tpu.iota {dimensions = array<i32: 0>} : vector<32x128xi32>
    %7 = vector.broadcast %5 : i32 to vector<32x128xi32>
    %8 = arith.addi %7, %6 : vector<32x128xi32>
    %c16_i32 = arith.constant 16 : i32
    %9 = vector.broadcast %c16_i32 : i32 to vector<32x128xi32>
    %10 = arith.cmpi slt, %8, %9 : vector<32x128xi32>
    %c0 = arith.constant 0 : index
    %c0_1 = arith.constant 0 : index
    %11 = vector.load %arg2[%c0, %c0_1] : memref<32x128xf32, #tpu.memory_space<vmem>>, vector<32x128xf32>
    %cst = arith.constant -1.000000e+04 : f32
    %12 = vector.broadcast %cst : f32 to vector<32x128xf32>
    %13 = arith.select %10, %11, %12 : vector<32x128xi1>, vector<32x128xf32>
    %c0_2 = arith.constant 0 : index
    %c0_3 = arith.constant 0 : index
    %14 = vector.load %arg3[%c0_2, %c0_3] : memref<32x128xf32, #tpu.memory_space<vmem>>, vector<32x128xf32>
    %cst_4 = arith.constant 0.000000e+00 : f32
    %15 = vector.broadcast %cst_4 : f32 to vector<32x128xf32>
    %16 = arith.select %10, %14, %15 : vector<32x128xi1>, vector<32x128xf32>
    %17 = math.absf %13 : vector<32x128xf32>
    %cst_5 = arith.constant 0.000000e+00 : f32
    %18 = vector.broadcast %cst_5 : f32 to vector<32x128xf32>
    %19 = arith.subf %18, %17 : vector<32x128xf32>
    %20 = math.exp %19 : vector<32x128xf32>
    %21 = math.log1p %20 : vector<32x128xf32>
    %cst_6 = arith.constant 0.000000e+00 : f32
    %22 = vector.broadcast %cst_6 : f32 to vector<32x128xf32>
    %23 = arith.cmpf oge, %13, %22 : vector<32x128xf32>
    %cst_7 = arith.constant 1.000000e+00 : f32
    %24 = vector.broadcast %cst_7 : f32 to vector<32x128xf32>
    %25 = arith.select %23, %24, %20 : vector<32x128xi1>, vector<32x128xf32>
    %cst_8 = arith.constant 1.000000e+00 : f32
    %26 = vector.broadcast %cst_8 : f32 to vector<32x128xf32>
    %27 = arith.addf %26, %20 : vector<32x128xf32>
    %28 = arith.divf %25, %27 : vector<32x128xf32>
    %cst_9 = arith.constant 0.000000e+00 : f32
    %29 = vector.broadcast %cst_9 : f32 to vector<32x128xf32>
    %30 = arith.subf %29, %21 : vector<32x128xf32>
    %31 = arith.subf %13, %21 : vector<32x128xf32>
    %32 = arith.select %23, %30, %31 : vector<32x128xi1>, vector<32x128xf32>
    %cst_10 = arith.constant 1.000000e+00 : f32
    %33 = vector.broadcast %cst_10 : f32 to vector<32x128xf32>
    %34 = arith.subf %33, %16 : vector<32x128xf32>
    %35 = arith.mulf %34, %13 : vector<32x128xf32>
    %36 = arith.subf %35, %32 : vector<32x128xf32>
    %c0_11 = arith.constant 0 : index
    %c0_12 = arith.constant 0 : index
    %c0_13 = arith.constant 0 : index
    %37 = vector.load %arg4[%c0_11, %c0_12, %c0_13] : memref<4x8x128xf32, #tpu.memory_space<vmem>>, vector<4x8x128xf32>
    %38 = arith.mulf %28, %16 : vector<32x128xf32>
    %39 = vector.shape_cast %38 : vector<32x128xf32> to vector<4x8x128xf32>
    %cst_14 = arith.constant dense<0.000000e+00> : vector<8x128xf32>
    %40 = vector.multi_reduction <add>, %39, %cst_14 [0] : vector<4x8x128xf32> to vector<8x128xf32>
    %41 = vector.shape_cast %28 : vector<32x128xf32> to vector<4x8x128xf32>
    %cst_15 = arith.constant dense<0.000000e+00> : vector<8x128xf32>
    %42 = vector.multi_reduction <add>, %41, %cst_15 [0] : vector<4x8x128xf32> to vector<8x128xf32>
    %43 = vector.shape_cast %16 : vector<32x128xf32> to vector<4x8x128xf32>
    %cst_16 = arith.constant dense<0.000000e+00> : vector<8x128xf32>
    %44 = vector.multi_reduction <add>, %43, %cst_16 [0] : vector<4x8x128xf32> to vector<8x128xf32>
    %45 = vector.shape_cast %36 : vector<32x128xf32> to vector<4x8x128xf32>
    %cst_17 = arith.constant dense<0.000000e+00> : vector<8x128xf32>
    %46 = vector.multi_reduction <add>, %45, %cst_17 [0] : vector<4x8x128xf32> to vector<8x128xf32>
    %47 = vector.shape_cast %40 : vector<8x128xf32> to vector<1x8x128xf32>
    %48 = vector.shape_cast %42 : vector<8x128xf32> to vector<1x8x128xf32>
    %49 = vector.shape_cast %44 : vector<8x128xf32> to vector<1x8x128xf32>
    %50 = vector.shape_cast %46 : vector<8x128xf32> to vector<1x8x128xf32>
    %51 = tpu.concatenate %47, %48, %49, %50 in 0 : vector<1x8x128xf32>, vector<1x8x128xf32>, vector<1x8x128xf32>, vector<1x8x128xf32> -> vector<4x8x128xf32>
    %52 = arith.addf %37, %51 : vector<4x8x128xf32>
    %c0_18 = arith.constant 0 : index
    %c0_19 = arith.constant 0 : index
    %c0_20 = arith.constant 0 : index
    %53 = vector.load %arg4[%c0_18, %c0_19, %c0_20] : memref<4x8x128xf32, #tpu.memory_space<vmem>>, vector<4x8x128xf32>
    tpu.vector_store %arg4[%c0_18, %c0_19, %c0_20], %52 {strides = array<i32>} : memref<4x8x128xf32, #tpu.memory_space<vmem>>, vector<4x8x128xf32>,
    return
  }
  func.func @transform_0(%arg0: i32, %arg1: i32) -> (i32, i32) {
    %c1_i32 = arith.constant 1 : i32
    %0 = arith.muli %arg0, %c1_i32 : i32
    %1 = arith.addi %0, %arg1 : i32
    %c0_i32 = arith.constant 0 : i32
    %2 = arith.minsi %1, %c0_i32 : i32
    %c0_i32_0 = arith.constant 0 : i32
    %c0_i32_1 = arith.constant 0 : i32
    return %2, %c0_i32_0 : i32, i32
  }
  func.func @transform_1(%arg0: i32, %arg1: i32) -> (i32, i32) {
    %c1_i32 = arith.constant 1 : i32
    %0 = arith.muli %arg0, %c1_i32 : i32
    %1 = arith.addi %0, %arg1 : i32
    %c0_i32 = arith.constant 0 : i32
    %2 = arith.minsi %1, %c0_i32 : i32
    %c0_i32_0 = arith.constant 0 : i32
    %c0_i32_1 = arith.constant 0 : i32
    return %2, %c0_i32_0 : i32, i32
  }
  func.func @transform_2(%arg0: i32, %arg1: i32) -> (i32, i32, i32) {
    %c0_i32 = arith.constant 0 : i32
    %c0_i32_0 = arith.constant 0 : i32
    %c0_i32_1 = arith.constant 0 : i32
    return %arg0, %c0_i32, %c0_i32_0 : i32, i32, i32
  }
}

</mosaic_0001>

<bundles_post_ra>
// kernel: tpu_custom_call.1
= control target key start
LH: loop header
LB: loop body
LE: loop exit
PB: predicated region body
PF: predicated region fallthrough
CT: control target
= control target key end

     0   :  { %7 = vsyncpa [#allocation3], 0  ;;  %s570_s0 = inlined_call_operand.hbm [shape: f32[16,128], index: 0, kind: input, shape index: {}]   ;;  %s571_s1 = inlined_call_operand.hbm [shape: f32[16,128], index: 1, kind: input, shape index: {}]   ;;  %s572_s2 = inlined_call_operand.hbm [shape: f32[4,8,128], index: 2, kind: output, shape index: {}]  }
   0x1   :  { %8 = vsyncpa [#allocation6], 0 }
   0x2   :  { %9 = vsyncpa [#allocation4], 0 }
   0x3   :  { %20 = vsyncadd [#allocation3], 256  ;;  %s25_s11 = sshll.u32 %s570_s0, 4  ;;  %s421_s12 = smov [#allocation2]   ;;  %s26_s11 = int_to_ptr.hbm [resolvable:$true] %s25_s11 }
   0x4   :  { %s27_s13 = sshll.u32 %s421_s12, 4  ;;  %s422_s14 = smov 128   ;;  %s28_s13 = int_to_ptr.vmem [resolvable:$true] %s27_s13 }
   0x5   :  { %s423_s15 = smov 8  }
   0x6   :  { %33 = dma.hbm_to_vmem [thread:$0]  %s26_s11, 256, %s28_s13, [#allocation3], %s422_s14, %s422_s14, %s423_s15  }
   0x7   :  { %44 = vsyncadd [#allocation6], 256  ;;  %s49_s18 = sshll.u32 %s571_s1, 4  ;;  %s424_s19 = smov [#allocation5]   ;;  %s50_s18 = int_to_ptr.hbm [resolvable:$true] %s49_s18 }
   0x8   :  { %s51_s20 = sshll.u32 %s424_s19, 4  ;;  %s52_s20 = int_to_ptr.vmem [resolvable:$true] %s51_s20 }
   0x9   :  { %57 = dma.hbm_to_vmem [thread:$0]  %s50_s18, 256, %s52_s20, [#allocation6], %s422_s14, %s422_s14, %s423_s15  }
   0xa   :  { %415 = dma.done.wait [#allocation3], 512  }
   0xb   :  { %416 = vsyncadd [#allocation3], 4294966784 }
   0xc   :  { %417 = dma.done.wait [#allocation6], 512  }
   0xd   :  { %418 = vsyncadd [#allocation6], 4294966784  ;;  %v425_v0 = vmov -14426.95   ;;  %v456_v2 = vld [vmem:[#allocation2] sm:$0xff]  ;;  %v458_v3 = vld [vmem:[#allocation2 + $0x8] sm:$0xff] }
   0xe   :  { %325 = vpow2.f32 %v425_v0  ;;  %v118_v4 = vand.u32 2147483647, %v456_v2  ;;  %v119_v5 = vand.u32 2147483647, %v458_v3  ;;  %v466_v13 = vld [vmem:[#allocation5] sm:$0xff]  ;;  %v468_v14 = vld [vmem:[#allocation5 + $0x8] sm:$0xff] }
   0xf   :  { %v280_v16 = vadd.f32 %v468_v14, %v466_v13  ;;  %v254_v28 = vsub.f32 1.0, %v466_v13  ;;  %vm170_vm0 = vcmp.ge.f32.partialorder %v456_v2, 0.0  ;;  %v255_v32 = vsub.f32 1.0, %v468_v14  ;;  %s426_s0 = smov [#allocation7]   ;;  %s300_s23 = sshll.u32 %s572_s2, 4  ;;  %s301_s23 = int_to_ptr.hbm [resolvable:$true] %s300_s23 }
  0x10   :  { %v122_v7 = vsub.f32 0.0, %v118_v4  ;;  %v123_v8 = vsub.f32 0.0, %v119_v5  ;;  %vm171_vm5 = vcmp.ge.f32.partialorder %v458_v3, 0.0  ;;  %s298_s1 = sshll.u32 %s426_s0, 4  ;;  %s299_s1 = int_to_ptr.vmem [resolvable:$true] %s298_s1 }
  0x11   :  { %292 = vst [vmem:[#allocation7 + $0x10] sm:$0xff] %v280_v16  ;;  %v496_v38 = vmul.f32 %v254_v28, %v456_v2  ;;  %v259_v45 = vmul.f32 %v255_v32, %v458_v3 }
  0x12   :  { %v126_v9 = vmul.f32 1.442695, %v122_v7  ;;  %v128_v10 = vmul.f32 1.442695, %v123_v8 }
  0x14   :  { %v454_v1 = vpop.eup %325 }
  0x15   :  { %v152_v6 = vadd.f32 1.0, %v454_v1  ;;  %v155_v11 = vmul.f32 -0.5, %v454_v1  ;;  %v158_v20 = vand.u32 2147483647, %v454_v1 }
  0x17   :  { %327 = vrcp.f32 %v152_v6  ;;  %v156_v18 = vadd.f32 1.0, %v155_v11  ;;  %v221_v24 = vand.u32 2147483647, %v152_v6  ;;  %v223_v26 = vand.u32 2147483648, %v152_v6 }
  0x18   :  { %329 = vlog2.f32 %v152_v6  ;;  %vm217_vm1 = vweird.f32 %v152_v6  ;;  %vm490_vm3 = vcmp.lt.f32.partialorder %v158_v20, 0.0004427343 }
  0x19   :  { %331 = vpow2.f32 %v126_v9  ;;  %v157_v29 = vmul.f32 %v454_v1, %v156_v18  ;;  %vm486_vm2 = vcmp.eq.f32.partialorder %v221_v24, 8.507059e+37  ;;  %v224_v36 = vor.u32 1.1754944e-38, %v223_v26 }
  0x1a   :  { %333 = vpow2.f32 %v128_v10 }
  0x1d   :  { %v464_v12 = vpop.eup %327 }
  0x1e   :  { %v213_v15 = vmul.f32 %v464_v12, %v152_v6  ;;  %v330_v17 = vpop.eup %329  ;;  %vm218_vm4 = vweird.f32 %v464_v12 }
  0x1f   :  { %v332_v19 = vpop.eup %331  ;;  %v154_v31 = vmul.f32 0.6931472, %v330_v17  ;;  %vm513_vm8 = vmor %vm217_vm1, %vm218_vm4 }
  0x20   :  { %v474_v21 = vpop.eup %333  ;;  %v134_v22 = vadd.f32 1.0, %v332_v19  ;;  %v214_v23 = vsub.f32 1.0, %v213_v15  ;;  %v137_v27 = vmul.f32 -0.5, %v332_v19  ;;  %v140_v41 = vand.u32 2147483647, %v332_v19 }
  0x21   :  { %v477_v25 = vadd.f32 1.0, %v474_v21  ;;  %v146_v30 = vmul.f32 -0.5, %v474_v21  ;;  %v174_v42 = vsel %vm170_vm0, 1.0, %v332_v19  ;;  %v160_v44 = vsel %vm490_vm3, %v157_v29, %v154_v31 }
  0x22   :  { %335 = vrcp.f32 %v134_v22  ;;  %v215_v33 = vmul.f32 %v464_v12, %v214_v23  ;;  %v138_v37 = vadd.f32 1.0, %v137_v27  ;;  %v191_v39 = vand.u32 2147483647, %v134_v22 }
  0x23   :  { %337 = vrcp.f32 %v477_v25  ;;  %v193_v40 = vand.u32 2147483648, %v134_v22  ;;  %v147_v43 = vadd.f32 1.0, %v146_v30  ;;  %vm187_vm6 = vweird.f32 %v134_v22 }
  0x24   :  { %339 = vlog2.f32 %v134_v22  ;;  %vm202_vm7 = vweird.f32 %v477_v25  ;;  %v216_v47 = vadd.f32 %v464_v12, %v215_v33  ;;  %v149_v48 = vand.u32 2147483647, %v474_v21 }
  0x25   :  { %341 = vlog2.f32 %v477_v25  ;;  %v206_v51 = vand.u32 2147483647, %v477_v25  ;;  %v208_v52 = vand.u32 2147483648, %v477_v25  ;;  %v139_v54 = vmul.f32 %v332_v19, %v138_v37 }
  0x26   :  { %vm517_vm9 = vcmp.eq.f32.partialorder %v191_v39, 8.507059e+37  ;;  %v194_v57 = vor.u32 1.1754944e-38, %v193_v40  ;;  %vm141_vm10 = vcmp.lt.f32.partialorder %v140_v41, 0.0004427343  ;;  %v148_v61 = vmul.f32 %v474_v21, %v147_v43 }
  0x27   :  { %v220_v0 = vsel %vm513_vm8, %v464_v12, %v216_v47  ;;  %vm150_vm13 = vcmp.lt.f32.partialorder %v149_v48, 0.0004427343  ;;  %vm526_vm14 = vcmp.eq.f32.partialorder %v206_v51, 8.507059e+37  ;;  %v209_v10 = vor.u32 1.1754944e-38, %v208_v52 }
  0x28   :  { %v336_v46 = vpop.eup %335  ;;  %v225_v17 = vsel %vm486_vm2, %v224_v36, %v220_v0  ;;  %v248_v19 = vsub.f32 -10000.0, %v160_v44 }
  0x29   :  { %v338_v49 = vpop.eup %337  ;;  %v183_v50 = vmul.f32 %v336_v46, %v134_v22  ;;  %vm188_vm11 = vweird.f32 %v336_v46  ;;  %v226_v30 = vmul.f32 %v454_v1, %v225_v17 }
  0x2a   :  { %v340_v55 = vpop.eup %339  ;;  %v198_v58 = vmul.f32 %v338_v49, %v477_v25  ;;  %vm203_vm12 = vweird.f32 %v338_v49  ;;  %vm531_vm15 = vmor %vm187_vm6, %vm188_vm11  ;;  %v175_v25 = vsel %vm171_vm5, 1.0, %v474_v21  ;;  %v264_v33 = vsub.f32 -10000.0, %v248_v19 }
  0x2b   :  { %v184_v59 = vsub.f32 1.0, %v183_v50  ;;  %v136_v60 = vmul.f32 0.6931472, %v340_v55  ;;  %v342_v62 = vpop.eup %341  ;;  %vm538_vm1 = vmor %vm202_vm7, %vm203_vm12 }
  0x2c   :  { %v199_v63 = vsub.f32 1.0, %v198_v58  ;;  %v145_v7 = vmul.f32 0.6931472, %v342_v62 }
  0x2d   :  { %v185_v4 = vmul.f32 %v336_v46, %v184_v59  ;;  %v142_v6 = vsel %vm141_vm10, %v139_v54, %v136_v60 }
  0x2e   :  { %v200_v9 = vmul.f32 %v338_v49, %v199_v63  ;;  %v242_v11 = vsub.f32 0.0, %v142_v6  ;;  %v246_v15 = vsub.f32 %v456_v2, %v142_v6  ;;  %v151_v18 = vsel %vm150_vm13, %v148_v61, %v145_v7 }
  0x2f   :  { %v186_v16 = vadd.f32 %v336_v46, %v185_v4  ;;  %v243_v22 = vsub.f32 0.0, %v151_v18  ;;  %v247_v23 = vsub.f32 %v458_v3, %v151_v18 }
  0x30   :  { %v201_v20 = vadd.f32 %v338_v49, %v200_v9  ;;  %v250_v24 = vsel %vm170_vm0, %v242_v11, %v246_v15 }
  0x31   :  { %v190_v26 = vsel %vm531_vm15, %v336_v46, %v186_v16  ;;  %v262_v27 = vsub.f32 %v496_v38, %v250_v24  ;;  %v251_v2 = vsel %vm171_vm5, %v243_v22, %v247_v23  ;;  %v272_v38 = vmul.f32 0.0, %v226_v30 }
  0x32   :  { %v195_v28 = vsel %vm517_vm9, %v194_v57, %v190_v26  ;;  %v205_v29 = vsel %vm538_vm1, %v338_v49, %v201_v20  ;;  %v263_v32 = vsub.f32 %v259_v45, %v251_v2 }
  0x33   :  { %v196_v31 = vmul.f32 %v195_v28, %v174_v42  ;;  %v210_v21 = vsel %vm526_vm14, %v209_v10, %v205_v29 }
  0x34   :  { %v211_v34 = vmul.f32 %v210_v21, %v175_v25  ;;  %v283_v36 = vadd.f32 %v263_v32, %v262_v27 }
  0x35   :  { %v270_v35 = vmul.f32 %v196_v31, %v466_v13 }
  0x36   :  { %v271_v37 = vmul.f32 %v211_v34, %v468_v14  ;;  %v277_v39 = vadd.f32 %v211_v34, %v196_v31  ;;  %v284_v40 = vadd.f32 %v283_v36, %v264_v33 }
  0x38   :  { %v274_v41 = vadd.f32 %v271_v37, %v270_v35  ;;  %v278_v1 = vadd.f32 %v277_v39, %v226_v30  ;;  %v285_v43 = vadd.f32 %v284_v40, %v264_v33 }
  0x3a   :  { %v275_v3 = vadd.f32 %v274_v41, %v272_v38  ;;  %v279_v44 = vadd.f32 %v278_v1, %v226_v30  ;;  %293 = vst [vmem:[#allocation7 + $0x18] sm:$0xff] %v285_v43 }
  0x3c   :  { %v276_v42 = vadd.f32 %v275_v3, %v272_v38  ;;  %291 = vst [vmem:[#allocation7 + $0x8] sm:$0xff] %v279_v44 }
  0x3e   :  { %290 = vst [vmem:[#allocation7] sm:$0xff] %v276_v42 }
  0x3f   :  { %306 = dma.vmem_to_hbm [thread:$0]  %s299_s1, 512, %s301_s23, [#allocation4], %s422_s14, %s422_s14, %s423_s15  }
  0x40   :  { %419 = dma.done.wait [#allocation4], 512  }
  0x41   :  { %420 = vsyncadd [#allocation4], 4294966784 }
  0x42   :  { %311 = vsyncpa [#allocation3], 1 }
  0x43   :  { %312 = vsyncpa [#allocation6], 1 }
  0x44   :  { %313 = vsyncpa [#allocation4], 1 }

</bundles_post_ra>
